<compile_context>
chip_gen: v7x
topology: tpu7x:2x2x1
jax: 0.10.0
libtpu: 0.0.40
codegen_flags: <defaults>
</compile_context>

<pallas_src>
import functools
import math

import jax
import jax.numpy as jnp
from jax.experimental import pallas as pl
from jax.experimental.pallas import tpu as pltpu


# ------------------------------------------------------------------ helpers --
def _ln(x, g, b, eps):
    mu = jnp.mean(x, axis=-1, keepdims=True)
    var = jnp.mean((x - mu) ** 2, axis=-1, keepdims=True)
    return (x - mu) * jax.lax.rsqrt(var + eps) * g + b


_GELU_C = math.sqrt(2.0 / math.pi)


def _gelu(x):
    # TODO(synk): PyTorch nn.GELU default is the exact erf form; tanh approx used here.
    return 0.5 * x * (1.0 + jnp.tanh(_GELU_C * (x + 0.044715 * x * x * x)))


def _mm(a, b):
    """a @ b on the MXU: bf16 operands (no-op cast if already bf16), f32 accum."""
    return jnp.dot(a.astype(jnp.bfloat16), b.astype(jnp.bfloat16),
                   preferred_element_type=jnp.float32)


def _mm_nt(a, b):
    """a @ b.T (contract last dims): bf16 operands, f32 accumulation."""
    return jax.lax.dot_general(a.astype(jnp.bfloat16), b.astype(jnp.bfloat16),
                               (((1,), (1,)), ((), ())),
                               preferred_element_type=jnp.float32)


def _softmax_rows(s):
    s = s - jnp.max(s, axis=-1, keepdims=True)
    p = jnp.exp(s)
    return p * pl.reciprocal(jnp.sum(p, axis=-1, keepdims=True), approx=True)


def _vmem_limit_bytes():
    """Per-generation scoped-VMEM budget (headroom under physical capacity)."""
    try:
        kind = jax.devices()[0].device_kind.lower()
    except Exception:  # pragma: no cover
        kind = ""
    if "v7" in kind or "7x" in kind:
        return 52 * 1024 * 1024          # 64 MiB physical per TC on v7x
    if "v6" in kind or "v5" in kind:
        return 96 * 1024 * 1024          # 128 MiB physical on v5e/v5p/v6e
    return 48 * 1024 * 1024              # conservative fallback


# --------------------------------------------------- patch-embed linear ------
def _linear_kernel(x_ref, w_ref, b_ref, o_ref):
    o_ref[...] = (_mm(x_ref[...], w_ref[...]) + b_ref[...]).astype(o_ref.dtype)


def _pick_tile(m, target=512):
    if m <= target:
        return m
    for t in (target, 256, 128, 64, 32, 16, 8):
        if m % t == 0:
            return t
    return m


def linear_tiled(x2d, w, b):
    M, K = x2d.shape
    Nout = w.shape[1]
    tm = _pick_tile(M)
    return pl.pallas_call(
        _linear_kernel,
        grid=(M // tm,),
        in_specs=[pl.BlockSpec((tm, K), lambda i: (i, 0)),
                  pl.BlockSpec((K, Nout), lambda i: (0, 0)),
                  pl.BlockSpec((1, Nout), lambda i: (0, 0))],
        out_specs=pl.BlockSpec((tm, Nout), lambda i: (i, 0)),
        out_shape=jax.ShapeDtypeStruct((M, Nout), jnp.bfloat16),
        compiler_params=pltpu.CompilerParams(dimension_semantics=("parallel",)),
    )(x2d, w, b)


def patch_embed(img, w, b, patch):
    """Conv2d(C, D, kernel=patch, stride=patch) + flatten(2) + transpose(1,2)."""
    B, C, H, W = img.shape
    Hp, Wp = H // patch, W // patch
    x = img.reshape(B, C, Hp, patch, Wp, patch)
    x = x.transpose(0, 2, 4, 1, 3, 5).reshape(B * Hp * Wp, C * patch * patch)
    y = linear_tiled(x.astype(jnp.bfloat16), w, b)            # bf16 activations
    return y.reshape(B, Hp * Wp, w.shape[1])


# ------------------------------------ fused blocks + ln1 + InterAttn + head --
def _fused_kernel(x_ref,
                  b_ln1w, b_ln1b, b_qkvw, b_qkvb, b_projw, b_projb,
                  b_ln2w, b_ln2b, b_fc1w, b_fc1b, b_fc2w, b_fc2b,
                  g_ln1w, g_ln1b, wq, bq, wk, bk, wv, bv,
                  normw, normb, headw, headb,
                  o_ref,
                  acc, saved, headbuf,
                  *, num_heads, bt, n_tok, i_sel,
                  eps_block, eps_ln1, eps_norm):
    l = pl.program_id(1)
    n_layers = pl.num_programs(1)

    @pl.when(l == 0)
    def _():
        for bi in range(bt):
            acc[bi * n_tok:(bi + 1) * n_tok, :] = x_ref[bi].astype(jnp.float32)

    x = acc[...]                               # (Bt*N, D) f32, resident in VMEM
    R, D = x.shape
    hd = D // num_heads

    # ---------------- ViT block l: MHSA branch (pre-LN) ----------------
    h = _ln(x, b_ln1w[0], b_ln1b[0], eps_block)
    qkv = _mm(h, b_qkvw[0]) + b_qkvb[0]        # (Bt*N, 3D); q pre-scaled (folded)
    for bi in range(bt):                       # images attend within themselves
        r0 = bi * n_tok
        for hh in range(num_heads):            # static unroll; heads are small here
            s0 = hh * hd
            q_h = qkv[r0:r0 + n_tok, s0:s0 + hd]
            k_h = qkv[r0:r0 + n_tok, D + s0:D + s0 + hd]
            v_h = qkv[r0:r0 + n_tok, 2 * D + s0:2 * D + s0 + hd]
            p = _softmax_rows(_mm_nt(q_h, k_h))            # (N, N)
            # "concat" = static lane-offset store; single K=D proj matmul below
            headbuf[r0:r0 + n_tok, s0:s0 + hd] = _mm(p, v_h)
    x = x + _mm(headbuf[...], b_projw[0]) + b_projb[0]

    # ---------------- ViT block l: MLP branch (pre-LN) -----------------
    h2 = _ln(x, b_ln2w[0], b_ln2b[0], eps_block)
    m = _gelu(_mm(h2, b_fc1w[0]) + b_fc1b[0])
    x = x + _mm(m, b_fc2w[0]) + b_fc2b[0]
    acc[...] = x

    # Save int_li[i] (output of block i) for InterAttention (bf16: K/V only).
    @pl.when(l == i_sel)
    def _():
        saved[...] = x.astype(saved.dtype)

    # ---------------- epilogue: ln1 + InterAttention + post + mean -----
    @pl.when(l == n_layers - 1)
    def _():
        kvsrc = saved[...]                                  # bf16
        hq = _ln(x, g_ln1w[...], g_ln1b[...], eps_ln1)      # self.ln1
        # TODO(synk): InterAttention is not defined in the reference source;
        #             implemented as single-head cross-attention (Q from
        #             ln1(inp), K/V from int_li[i]) with the residual add fused.
        qc = _mm(hq, wq[...]) + bq[...]                     # 1/sqrt(D) folded in
        kc = _mm(kvsrc, wk[...]) + bk[...]
        vc = _mm(kvsrc, wv[...]) + bv[...]
        for bi in range(bt):
            r0 = bi * n_tok
            p = _softmax_rows(_mm_nt(qc[r0:r0 + n_tok], kc[r0:r0 + n_tok]))
            out_i = _mm(p, vc[r0:r0 + n_tok]) + hq[r0:r0 + n_tok]
            hn = _ln(out_i, normw[...], normb[...], eps_norm)   # model.norm
            pooled = jnp.mean(hn, axis=0, keepdims=True)        # token mean
            # head after mean (linear commutes with mean); lane-dense 128 cols
            o_ref[bi:bi + 1, :] = (_mm(pooled, headw[...])
                                   + headb[...]).astype(o_ref.dtype)


def _pick_batch_tile(B, N, D, D_mlp, budget_bytes):
    # Rough resident f32 footprint per image inside the fused kernel.
    per_img = N * (2 * D + 3 * D + max(D_mlp, 3 * D)) * 4 + N * D * 2
    bt = B
    while bt > 1 and (B % bt != 0 or bt * per_img > budget_bytes):
        bt -= 1
    return max(bt, 1)


def fused_blocks_head(x, params, i_sel, *, num_heads):
    B, N, D = x.shape
    blk = params["blk"]
    depth = blk["qkv_w"].shape[0]
    Cpad = params["head_w"].shape[1]
    assert 0 <= i_sel < depth

    vmem_limit = _vmem_limit_bytes()
    Bt = _pick_batch_tile(B, N, D, blk["fc1_w"].shape[2], vmem_limit // 3)

    blk_names = ["ln1_w", "ln1_b", "qkv_w", "qkv_b", "proj_w", "proj_b",
                 "ln2_w", "ln2_b", "fc1_w", "fc1_b", "fc2_w", "fc2_b"]
    blk_args = [blk[n] for n in blk_names]
    blk_specs = [pl.BlockSpec((1,) + a.shape[1:], lambda b, l: (l, 0, 0))
                 for a in blk_args]

    epi_names = ["ln1_w", "ln1_b", "attn_wq", "attn_bq", "attn_wk", "attn_bk",
                 "attn_wv", "attn_bv", "norm_w", "norm_b", "head_w", "head_b"]
    epi_args = [params[n] for n in epi_names]
    epi_specs = [pl.BlockSpec(a.shape, lambda b, l: (0, 0)) for a in epi_args]

    out = pl.pallas_call(
        functools.partial(_fused_kernel, num_heads=num_heads, bt=Bt, n_tok=N,
                          i_sel=int(i_sel), eps_block=1e-6, eps_ln1=1e-5,
                          eps_norm=1e-6),
        grid=(B // Bt, depth),
        in_specs=[pl.BlockSpec((Bt, N, D), lambda b, l: (b, 0, 0))]
                 + blk_specs + epi_specs,
        out_specs=pl.BlockSpec((Bt, Cpad), lambda b, l: (b, 0)),
        out_shape=jax.ShapeDtypeStruct((B, Cpad), jnp.float32),
        scratch_shapes=[pltpu.VMEM((Bt * N, D), jnp.float32),   # running activation
                        pltpu.VMEM((Bt * N, D), jnp.bfloat16),  # int_li[i] (K/V only)
                        pltpu.VMEM((Bt * N, D), jnp.float32)],  # head concat buffer
        compiler_params=pltpu.CompilerParams(
            dimension_semantics=("parallel", "arbitrary"),
            vmem_limit_bytes=vmem_limit),
    )(x, *blk_args, *epi_args)
    return out[:, :params["num_classes"]]


# ----------------------------------------------------------------- forward ---
def intervit_forward(params, feature, i):
    # pre: patch_embed + pos_drop (dropout == identity at inference)
    inp = patch_embed(feature, params["patch_w"], params["patch_b"],
                      params["patch"])
    # blocks + ln1 + InterAttention(+residual) + norm/fc_norm/head + mean(dim=1)
    return fused_blocks_head(inp, params, int(i),
                             num_heads=params["num_heads"])


# ------------------------------------------------------------------- params --
def init_params(key, *, C=3, patch=8, D=32, depth=2, num_heads=4,
                mlp_ratio=2, num_classes=10):
    assert D % num_heads == 0
    Dm = D * mlp_ratio
    hd = D // num_heads
    Cpad = max(128, ((num_classes + 127) // 128) * 128)      # lane-dense head
    keys = iter(jax.random.split(key, 64))

    def wf(shape):                                            # f32 init values
        return 0.02 * jax.random.normal(next(keys), shape, jnp.float32)

    def w(shape):                                             # bf16 MXU weights
        return wf(shape).astype(jnp.bfloat16)

    ones = lambda *s: jnp.ones(s, jnp.float32)
    zeros = lambda *s: jnp.zeros(s, jnp.float32)

    # Fold 1/sqrt(hd) into the q columns of qkv (one-time constant fold).
    q_scale = 1.0 / math.sqrt(hd)
    scale_vec = jnp.concatenate(
        [jnp.full((D,), q_scale, jnp.float32), jnp.ones((2 * D,), jnp.float32)])
    qkv_w = (wf((depth, D, 3 * D)) * scale_vec).astype(jnp.bfloat16)
    qkv_b = zeros(depth, 1, 3 * D) * scale_vec

    # Fold the epilogue 1/sqrt(D) scale into wq/bq.
    e_scale = 1.0 / math.sqrt(D)
    attn_wq = (wf((D, D)) * e_scale).astype(jnp.bfloat16)
    attn_bq = zeros(1, D) * e_scale

    head_w = (jnp.zeros((D, Cpad), jnp.float32)
              .at[:, :num_classes].set(wf((D, num_classes)))
              .astype(jnp.bfloat16))

    # per-block weights stacked along a leading depth axis (picked by index_map)
    blk = {
        "ln1_w": ones(depth, 1, D), "ln1_b": zeros(depth, 1, D),
        "qkv_w": qkv_w, "qkv_b": qkv_b,
        "proj_w": w((depth, D, D)), "proj_b": zeros(depth, 1, D),
        "ln2_w": ones(depth, 1, D), "ln2_b": zeros(depth, 1, D),
        "fc1_w": w((depth, D, Dm)), "fc1_b": zeros(depth, 1, Dm),
        "fc2_w": w((depth, Dm, D)), "fc2_b": zeros(depth, 1, D),
    }
    return {
        "patch": patch, "num_heads": num_heads, "num_classes": num_classes,
        "patch_w": w((C * patch * patch, D)), "patch_b": zeros(1, D),
        "blk": blk,
        "ln1_w": ones(1, D), "ln1_b": zeros(1, D),
        "attn_wq": attn_wq, "attn_bq": attn_bq,
        "attn_wk": w((D, D)), "attn_bk": zeros(1, D),
        "attn_wv": w((D, D)), "attn_bv": zeros(1, D),
        "norm_w": ones(1, D), "norm_b": zeros(1, D),
        "head_w": head_w, "head_b": zeros(1, Cpad),
    }


if __name__ == "__main__":
    key = jax.random.PRNGKey(0)
    pkey, xkey = jax.random.split(key)
    params = init_params(pkey)

    # small image: B=2, C=3, H=W=16, patch=8 -> N=4 tokens, D=32, classes=10
    feature = jax.random.normal(xkey, (2, 3, 16, 16), jnp.float32)

    out = intervit_forward(params, feature, i=1)
    out = jax.block_until_ready(out)
    assert out.shape == (2, 10), out.shape
    assert jnp.all(jnp.isfinite(out))
    print("KERNEL_OK")
</pallas_src>

<mosaic_0001>
module attributes {stable_mosaic.version = 11 : i64} {
  func.func @_linear_kernel(%arg0: i32, %arg1: memref<8x192xbf16, #tpu.memory_space<vmem>>, %arg2: memref<192x32xbf16, #tpu.memory_space<vmem>>, %arg3: memref<1x32xf32, #tpu.memory_space<vmem>>, %arg4: memref<8x32xbf16, #tpu.memory_space<vmem>>) attributes {dimension_semantics = [#tpu.dimension_semantics<parallel>], iteration_bounds = array<i64: 1>, scalar_prefetch = 0 : i64, scratch_operands = 0 : i64, tpu.core_type = #tpu.core_type<tc>, window_params = [{transform_indices = @transform_0, window_bounds = array<i64: 8, 192>}, {pipeline_mode = #tpu.pipeline_mode<synchronous>, transform_indices = @transform_1, window_bounds = array<i64: 192, 32>}, {pipeline_mode = #tpu.pipeline_mode<synchronous>, transform_indices = @transform_2, window_bounds = array<i64: 1, 32>}, {transform_indices = @transform_3, window_bounds = array<i64: 8, 32>}]} {
    %c0 = arith.constant 0 : index
    %c0_0 = arith.constant 0 : index
    %0 = vector.load %arg1[%c0, %c0_0] : memref<8x192xbf16, #tpu.memory_space<vmem>>, vector<8x192xbf16>
    %c0_1 = arith.constant 0 : index
    %c0_2 = arith.constant 0 : index
    %1 = vector.load %arg2[%c0_1, %c0_2] : memref<192x32xbf16, #tpu.memory_space<vmem>>, vector<192x32xbf16>
    %cst = arith.constant dense<0.000000e+00> : vector<8x32xf32>
    %2 = tpu.matmul %0, %1, %cst {dimension_numbers = #tpu.dot_dimension_numbers<[1], [0], [0], [1], [0, 0, 1, 1], [], []>} : vector<8x192xbf16>, vector<192x32xbf16>, vector<8x32xf32> -> vector<8x32xf32>
    %c0_3 = arith.constant 0 : index
    %c0_4 = arith.constant 0 : index
    %3 = vector.load %arg3[%c0_3, %c0_4] : memref<1x32xf32, #tpu.memory_space<vmem>>, vector<1x32xf32>
    %4 = vector.broadcast %3 : vector<1x32xf32> to vector<8x32xf32>
    %5 = arith.addf %2, %4 : vector<8x32xf32>
    %6 = arith.truncf %5 : vector<8x32xf32> to vector<8x32xbf16>
    %c0_5 = arith.constant 0 : index
    %c0_6 = arith.constant 0 : index
    %7 = vector.load %arg4[%c0_5, %c0_6] : memref<8x32xbf16, #tpu.memory_space<vmem>>, vector<8x32xbf16>
    tpu.vector_store %arg4[%c0_5, %c0_6], %6 {strides = array<i32>} : memref<8x32xbf16, #tpu.memory_space<vmem>>, vector<8x32xbf16>,
    return
  }
  func.func @transform_0(%arg0: i32) -> (i32, i32) {
    %c0_i32 = arith.constant 0 : i32
    %c0_i32_0 = arith.constant 0 : i32
    return %arg0, %c0_i32 : i32, i32
  }
  func.func @transform_1(%arg0: i32) -> (i32, i32) {
    %c0_i32 = arith.constant 0 : i32
    %c0_i32_0 = arith.constant 0 : i32
    %c0_i32_1 = arith.constant 0 : i32
    return %c0_i32, %c0_i32_0 : i32, i32
  }
  func.func @transform_2(%arg0: i32) -> (i32, i32) {
    %c0_i32 = arith.constant 0 : i32
    %c0_i32_0 = arith.constant 0 : i32
    %c0_i32_1 = arith.constant 0 : i32
    return %c0_i32, %c0_i32_0 : i32, i32
  }
  func.func @transform_3(%arg0: i32) -> (i32, i32) {
    %c0_i32 = arith.constant 0 : i32
    %c0_i32_0 = arith.constant 0 : i32
    return %arg0, %c0_i32 : i32, i32
  }
}

</mosaic_0001>

<bundles_post_ra>
// kernel: tpu_custom_call.1
= control target key start
LH: loop header
LB: loop body
LE: loop exit
PB: predicated region body
PF: predicated region fallthrough
CT: control target
= control target key end

     0   :  { %v243_v1 = vmov 0   ;;  %vm126_vm0 = vcmask 523264   ;;  %s319_s0 = inlined_call_operand.vmem [shape: bf16[8,192], index: 0, kind: input, shape index: {}]   ;;  %s320_s1 = inlined_call_operand.vmem [shape: bf16[192,32], index: 1, kind: input, shape index: {}]   ;;  %s321_s2 = inlined_call_operand.vmem [shape: f32[1,32], index: 2, kind: input, shape index: {}]   ;;  %s322_s3 = inlined_call_operand.hbm [shape: bf16[8,32], index: 3, kind: output, shape index: {}]  }
   0x1   :  { %v205_v0 = vld [vmem:[%s320_s1] sm:$0xff]   ;;  %130 = vmatprep.subr.bf16.mxu0 %v243_v1  ;;  %v206_v2 = vld [vmem:[%s320_s1 + $0x8] sm:$0xff]   ;;  %v207_v3 = vld [vmem:[%s320_s1 + $0x10] sm:$0xff]  }
   0x2   :  { %131 = vmatpush1.bf16.msra.mxu0 %v205_v0  ;;  %v208_v4 = vld [vmem:[%s320_s1 + $0x18] sm:$0xff]   ;;  %v16_v5 = vld [vmem:[%s319_s0] sm:$0xff] }
   0x3   :  { %132 = vmatprep.subr.bf16.mxu0 %v243_v1 }
   0x6   :  { %133 = vmatpush1.bf16.msra.mxu0 %v206_v2 }
   0x7   :  { %134 = vmatprep.subr.bf16.mxu0 %v243_v1 }
   0xa   :  { %135 = vmatpush1.bf16.msra.mxu0 %v207_v3 }
   0xb   :  { %136 = vmatprep.subr.bf16.mxu0 %v243_v1 }
   0xc   :  { %8 = vsyncpa [#allocation3], 0  ;;  %v189_v6 = vcombine.high %v16_v5, %v16_v5  ;;  %v209_v7 = vld [vmem:[%s320_s1 + $0x20] sm:$0xff]   ;;  %v210_v8 = vld [vmem:[%s320_s1 + $0x28] sm:$0xff]   ;;  %v188_v15 = vcombine.low %v16_v5, %v16_v5  ;;  %s244_s12 = smov [#allocation2]   ;;  %vm171_vm1 = vcmask 257024  }
   0xd   :  { %v211_v9 = vld [vmem:[%s320_s1 + $0x30] sm:$0xff]   ;;  %v212_v10 = vld [vmem:[%s320_s1 + $0x38] sm:$0xff]   ;;  %v213_v11 = vld [vmem:[%s320_s1 + $0x40] sm:$0xff]   ;;  %s179_s13 = sshll.u32 %s244_s12, 4  ;;  %s180_s13 = int_to_ptr.vmem [resolvable:$true] %s179_s13 }
   0xe   :  { %137 = vmatpush1.bf16.msra.mxu0 %v208_v4  ;;  %202 = vmatprep.mubr.msk.bf16.mxu0 %vm126_vm0, %v189_v6  ;;  %v214_v12 = vld [vmem:[%s320_s1 + $0x48] sm:$0xff]   ;;  %v215_v13 = vld [vmem:[%s320_s1 + $0x50] sm:$0xff]   ;;  %v216_v14 = vld [vmem:[%s320_s1 + $0x58] sm:$0xff]   ;;  %s219_s1 = scalar_lea.vmem %s180_s13, 64  ;;  %p224_p1 = scmp.lt.s32.totalorder %s180_s13, %s180_s13 }
   0xf   :  { %138 = vmatprep.subr.bf16.mxu0 %v243_v1  ;;  %v187_v16 = vld [vmem:[%s321_s2] ss:$0 sm:$0xff]  ;;  %p220_p0 = scmp.ne.s32.totalorder %s180_s13, %s219_s1  ;;  %p225_p2 = scmp.lt.s32.totalorder %s219_s1, %s219_s1 }
  0x11   :  { %p226_p3 = por %p225_p2, %p224_p1 }
  0x12   :  { %139 = vmatpush1.bf16.msra.mxu0 %v209_v7 }
  0x13   :  { %140 = vmatprep.subr.bf16.mxu0 %v243_v1  ;;  %p227_p4 = pnand %p226_p3, %p220_p0 }
  0x16   :  { %141 = vmatpush1.bf16.msra.mxu0 %v210_v8 }
  0x17   :  { %142 = vmatprep.subr.bf16.mxu0 %v243_v1 }
  0x1a   :  { %143 = vmatpush1.bf16.msra.mxu0 %v211_v9 }
  0x1b   :  { %144 = vmatprep.subr.bf16.mxu0 %v243_v1 }
  0x1e   :  { %145 = vmatpush1.bf16.msra.mxu0 %v212_v10 }
  0x1f   :  { %146 = vmatprep.subr.bf16.mxu0 %v243_v1 }
  0x22   :  { %147 = vmatpush1.bf16.msra.mxu0 %v213_v11 }
  0x23   :  { %148 = vmatprep.subr.bf16.mxu0 %v243_v1 }
  0x26   :  { %149 = vmatpush1.bf16.msra.mxu0 %v214_v12 }
  0x27   :  { %150 = vmatprep.subr.bf16.mxu0 %v243_v1 }
  0x2a   :  { %151 = vmatpush1.bf16.msra.mxu0 %v215_v13 }
  0x2b   :  { %152 = vmatprep.subr.bf16.mxu0 %v243_v1 }
  0x2e   :  { %153 = vmatpush1.bf16.msra.mxu0 %v216_v14 }
  0x31   :  { %163 = vmatmul.mubr.bf16.vlgmr.msra.gmra.mrb[0].mxu0 %v188_v15 }
 0x104   :  { %v164_v17 = vpop.f32.mrb[0].mxu0 }
 0x105   :  { %v165_v18 = vadd.f32 %v187_v16, %v164_v17  ;;  %v166_v19 = vpop.f32.mrb[1].mxu0 }
 0x106   :  { %v167_v20 = vpop.f32.mrb[2].mxu0 }
 0x107   :  { %v170_v21 = vpack.c.bf16 %v165_v18, %v165_v18  ;;  %v168_v22 = vpop.f32.mrb[3].mxu0 }
 0x109   :  { %172 = vst.msk [vmem:[#allocation2] sm:$0xf] %vm171_vm1, %v170_v21 }
 0x10a   :  { %230 = shalt.err (!%p227_p4)
}
 0x10b   :  { %s231_s15 = scalar_lea.hbm %s322_s3, 64 }
 0x10c   :  { %p232_p5 = scmp.ne.s32.totalorder %s322_s3, %s231_s15  ;;  %p235_p6 = scmp.lt.u32.totalorder %s231_s15, %s322_s3 }
 0x10e   :  { %p237_p7 = pnand %p235_p6, %p232_p5 }
 0x110   :  { %240 = shalt.err (!%p237_p7)
}
 0x111   :  { %182 = dma.vmem_to_hbm [thread:$0]  %s180_s13, 64, %s322_s3, [#allocation3]  }
 0x112   :  { %241 = dma.done.wait [#allocation3], 64  }
 0x113   :  { %242 = vsyncadd [#allocation3], 4294967232 }
 0x114   :  { %186 = vsyncpa [#allocation3], 1 }

</bundles_post_ra>
